<compile_context>
chip_gen: v7x
topology: tpu7x:2x2x1
jax: 0.10.0
libtpu: 0.0.40
codegen_flags: <defaults>
</compile_context>

<pallas_src>
import functools
import math

import jax
import jax.numpy as jnp
from jax.experimental import pallas as pl
from jax.experimental.pallas import tpu as pltpu

_LOG_2 = math.log(2.0)


def _round_up(x, m):
    return ((x + m - 1) // m) * m


def _vmem_capacity_bytes():
    try:
        info = pltpu.get_tpu_info()
        cap = getattr(info, "vmem_capacity_bytes", None)
        if cap:
            return int(cap)
    except Exception:
        pass
    return 64 << 20  # conservative fallback (v7x-sized)


def _expectations(res, measure):
    """Elementwise (pos_expectation(res), neg_expectation(res), pos_at_0, neg_at_0).

    The *_at_0 constants are what masked-out entries contribute in the PyTorch
    code (expectation applied AFTER res*mask, so masked entries become f(0)).
    """
    log2 = _LOG_2
    if measure in ('GAN', 'JSD'):
        sp = jnp.logaddexp(-res, 0.0)          # softplus(-res), shared (EUP)
        if measure == 'GAN':
            return -sp, sp + res, -log2, log2
        return log2 - sp, sp + res - log2, 0.0, 0.0   # JSD: f(0)=g(0)=0
    if measure == 'X2':
        return res * res, -0.5 * (jnp.abs(res) + 1.0) ** 2, 0.0, -0.5
    if measure == 'KL':
        return res + 1.0, jnp.exp(res), 1.0, 1.0
    if measure == 'RKL':
        return -jnp.exp(-res), res - 1.0, -1.0, -1.0
    if measure == 'H2':
        return 1.0 - jnp.exp(-res), jnp.exp(res) - 1.0, 0.0, 0.0
    if measure == 'W1':
        return res, res, 0.0, 0.0
    raise NotImplementedError(
        "Measure `{}` not supported. Supported: "
        "['GAN', 'JSD', 'X2', 'KL', 'RKL', 'DV', 'H2', 'W1']".format(measure))


def _local_global_loss_kernel(batch_ref, g_ref, l_ref, out_ref,
                              acc_ref, dv_m_ref, dv_s_ref,
                              *, measure, num_nodes, num_graphs, tile_n,
                              tiles_per_split, has_remainder, mxu_precision):
    c = pl.program_id(0)                      # split (TensorCore) index
    i = pl.program_id(1)                      # node-tile index within split
    last = tiles_per_split - 1
    node_start = (c * tiles_per_split + i) * tile_n   # logical (unclamped) offset

    @pl.when(i == 0)
    def _init():
        acc_ref[...] = jnp.zeros_like(acc_ref)
        if measure == 'DV':
            dv_m_ref[...] = jnp.full_like(dv_m_ref, -jnp.inf)
            dv_s_ref[...] = jnp.zeros_like(dv_s_ref)

    # res[g, t] = <g_enc[g, :], l_enc[node_start + t, :]>  ->  [G, TILE_N]
    # Lane-dense orientation (nodes on lanes); f32 MXU accumulation.
    res = jax.lax.dot_general(
        g_ref[...], l_ref[...],
        dimension_numbers=(((1,), (1,)), ((), ())),
        preferred_element_type=jnp.float32,
        precision=mxu_precision)

    graph_iota = jax.lax.broadcasted_iota(jnp.int32, res.shape, 0)
    pos = batch_ref[...] == graph_iota          # [1,T] vs [G,T] -> [G,T] bool

    inv_pos = 1.0 / float(num_nodes)
    denom_neg = num_nodes * (num_graphs - 1)
    inv_neg = (1.0 / float(denom_neg)) if denom_neg > 0 else float('inf')

    if measure == 'DV':
        node_iota = jax.lax.broadcasted_iota(jnp.int32, res.shape, 1) + node_start
        valid = node_iota < num_nodes
        # Positive part: sum of res at valid pos entries (deferred scaling).
        acc_ref[...] += jnp.where(jnp.logical_and(valid, pos), res, 0.0)
        # Negative part: per-graph online log-sum-exp over nodes of
        # q = res*neg_mask (pos entries 0, padded/OOB rows -inf).
        q = jnp.where(valid, jnp.where(pos, 0.0, res), -jnp.inf)
        tile_max = jnp.max(q, axis=1, keepdims=True)               # [G, 1]
        m_new = jnp.maximum(dv_m_ref[...], tile_max)
        dv_s_ref[...] = (dv_s_ref[...] * jnp.exp(dv_m_ref[...] - m_new)
                         + jnp.sum(jnp.exp(q - m_new), axis=1, keepdims=True))
        dv_m_ref[...] = m_new

        @pl.when(i == last)
        def _finalize():
            lse = (jnp.log(dv_s_ref[...]) + dv_m_ref[...]
                   - math.log(float(num_nodes)))                   # [G, 1]
            total = inv_neg * jnp.sum(lse) - inv_pos * jnp.sum(acc_ref[...])
            out_ref[...] = jnp.reshape(total, (1, 1, 1))
    else:
        f_res, g_res, f_zero, g_zero = _expectations(res, measure)
        # Per-entry contribution to (E_neg - E_pos), exactly matching PyTorch's
        # "mask first, then expectation" order.
        base = jnp.where(pos,
                         g_zero * inv_neg - f_res * inv_pos,
                         g_res * inv_neg - f_zero * inv_pos)
        if has_remainder:
            full = node_start + tile_n <= num_nodes

            @pl.when(full)                      # interior tiles: no validity mask
            def _full_tile():
                acc_ref[...] += base

            @pl.when(jnp.logical_not(full))     # boundary / overhang tiles
            def _partial_tile():
                node_iota = (jax.lax.broadcasted_iota(jnp.int32, res.shape, 1)
                             + node_start)
                acc_ref[...] += jnp.where(node_iota < num_nodes, base, 0.0)
        else:
            acc_ref[...] += base

        @pl.when(i == last)
        def _finalize():
            out_ref[...] = jnp.reshape(jnp.sum(acc_ref[...]), (1, 1, 1))


def local_global_loss(l_enc, g_enc, batch, measure='JSD', tile_n=None):
    """Pallas equivalent of LocalGlobalLoss.forward(l_enc, g_enc, batch, measure).

    Precondition (same as the PyTorch module): num_graphs >= 2, otherwise the
    negative-expectation denominator is zero.
    """
    l_enc = jnp.asarray(l_enc)
    g_enc = jnp.asarray(g_enc)
    num_nodes, hidden = l_enc.shape
    num_graphs = g_enc.shape[0]
    if g_enc.dtype != l_enc.dtype:
        g_enc = g_enc.astype(l_enc.dtype)
    batch2d = jnp.asarray(batch, jnp.int32).reshape(1, num_nodes)

    itemsize = jnp.dtype(l_enc.dtype).itemsize
    vmem_cap = _vmem_capacity_bytes()

    # --- node-tile sizing: ~2 MiB l_enc blocks, fitted to this chip's VMEM ---
    if tile_n is None:
        tile_n = _round_up(max((2 << 20) // max(hidden * itemsize, 1), 1), 128)
        tile_n = max(512, min(tile_n, 8192))
    tile_n = _round_up(max(tile_n, 128), 128)
    tile_n = min(tile_n, _round_up(num_nodes, 128))   # never bigger than needed

    g_pad8 = _round_up(num_graphs, 8)

    def vmem_need(t):
        return (2 * t * hidden * itemsize               # l_enc (double-buffered)
                + 2 * t * 4                             # batch ids (double-buffered)
                + 2 * num_graphs * hidden * itemsize    # resident g_enc
                + g_pad8 * t * 4                        # acc scratch
                + 6 * g_pad8 * t * 4)                   # res + elementwise temps

    budget = int(0.70 * vmem_cap)
    while tile_n > 128 and vmem_need(tile_n) > budget:
        tile_n = _round_up(max(tile_n // 2, 128), 128)

    num_tiles = pl.cdiv(num_nodes, tile_n)
    # Split the node-tile range across TensorCores (v7x); DV keeps one split
    # because its online LSE state would need a cross-split merge.
    num_splits = 1 if (measure == 'DV' or num_tiles < 2) else 2
    tiles_per_split = pl.cdiv(num_tiles, num_splits)
    has_remainder = (num_splits * tiles_per_split * tile_n != num_nodes)
    last_tile = num_tiles - 1

    mxu_precision = (jax.lax.Precision.HIGHEST
                     if l_enc.dtype == jnp.float32 else jax.lax.Precision.DEFAULT)

    kernel = functools.partial(
        _local_global_loss_kernel,
        measure=measure, num_nodes=num_nodes, num_graphs=num_graphs,
        tile_n=tile_n, tiles_per_split=tiles_per_split,
        has_remainder=has_remainder, mxu_precision=mxu_precision)

    vmem_limit = int(min(max(2 * vmem_need(tile_n), 32 << 20),
                         int(0.85 * vmem_cap)))

    def node_block(c, i):
        # Clamp so a (fully) out-of-range logical tile re-reads the last real
        # tile instead of issuing an OOB DMA; the kernel masks it to zero.
        return (jnp.minimum(c * tiles_per_split + i, last_tile), 0)

    def batch_block(c, i):
        return (0, jnp.minimum(c * tiles_per_split + i, last_tile))

    out = pl.pallas_call(
        kernel,
        out_shape=jax.ShapeDtypeStruct((num_splits, 1, 1), jnp.float32),
        grid=(num_splits, tiles_per_split),
        in_specs=[
            pl.BlockSpec((1, tile_n), batch_block),                 # batch ids
            pl.BlockSpec((num_graphs, hidden), lambda c, i: (0, 0)),  # g_enc (resident)
            pl.BlockSpec((tile_n, hidden), node_block),             # l_enc (streamed)
        ],
        out_specs=pl.BlockSpec((1, 1, 1), lambda c, i: (c, 0, 0)),  # per-split partial
        scratch_shapes=[
            pltpu.VMEM((num_graphs, tile_n), jnp.float32),  # deferred contribution acc
            pltpu.VMEM((num_graphs, 1), jnp.float32),       # DV running max
            pltpu.VMEM((num_graphs, 1), jnp.float32),       # DV running sum-exp
        ],
        compiler_params=pltpu.CompilerParams(
            dimension_semantics=("parallel", "arbitrary"),
            vmem_limit_bytes=vmem_limit,
        ),
    )(batch2d, g_enc, l_enc)
    return jnp.sum(out)


def _reference_loss(l_enc, g_enc, batch, measure):
    """Pure-JAX reference mirroring the PyTorch forward (mask, then expectation)."""
    log2 = math.log(2.0)
    num_nodes = l_enc.shape[0]
    num_graphs = g_enc.shape[0]
    pos_mask = (batch[:, None] == jnp.arange(num_graphs)[None, :]).astype(jnp.float32)
    neg_mask = 1.0 - pos_mask
    res = jnp.dot(l_enc.astype(jnp.float32), g_enc.astype(jnp.float32).T,
                  precision=jax.lax.Precision.HIGHEST)
    p = res * pos_mask
    q = res * neg_mask

    def softplus(x):
        return jnp.logaddexp(x, 0.0)

    if measure == 'GAN':
        Ep = -softplus(-p); Eq = softplus(-q) + q
    elif measure == 'JSD':
        Ep = log2 - softplus(-p); Eq = softplus(-q) + q - log2
    elif measure == 'X2':
        Ep = p ** 2; Eq = -0.5 * (jnp.sqrt(q ** 2) + 1.0) ** 2
    elif measure == 'KL':
        Ep = p + 1.0; Eq = jnp.exp(q)
    elif measure == 'RKL':
        Ep = -jnp.exp(-p); Eq = q - 1.0
    elif measure == 'DV':
        Ep = p
        x_max = jnp.max(q, axis=0)
        Eq = jnp.log(jnp.sum(jnp.exp(q - x_max), axis=0)) + x_max - math.log(num_nodes)
    elif measure == 'H2':
        Ep = 1.0 - jnp.exp(-p); Eq = jnp.exp(q) - 1.0
    elif measure == 'W1':
        Ep = p; Eq = q
    else:
        raise NotImplementedError(measure)

    E_pos = jnp.sum(Ep) / num_nodes
    E_neg = jnp.sum(Eq) / (num_nodes * (num_graphs - 1))
    return E_neg - E_pos


if __name__ == "__main__":
    key = jax.random.PRNGKey(0)
    k1, k2 = jax.random.split(key)

    num_graphs = 6
    nodes_per_graph = 50
    num_nodes = num_graphs * nodes_per_graph   # 300 nodes
    hidden = 64
    scale = hidden ** -0.25                    # keep <l, g> ~ O(1) so exp() stays tame

    l_enc = jax.random.normal(k1, (num_nodes, hidden), dtype=jnp.float32) * scale
    g_enc = jax.random.normal(k2, (num_graphs, hidden), dtype=jnp.float32) * scale
    batch = jnp.repeat(jnp.arange(num_graphs, dtype=jnp.int32), nodes_per_graph)

    measures = ['GAN', 'JSD', 'X2', 'KL', 'RKL', 'DV', 'H2', 'W1']

    # Small forced tile (128) -> multi-tile grid, exercises the split axis,
    # the boundary-tile masked path and the clamped overhang tile.
    for m in measures:
        loss = local_global_loss(l_enc, g_enc, batch, measure=m, tile_n=128)
        loss = jax.block_until_ready(loss)
        ref = _reference_loss(l_enc, g_enc, batch, m)
        assert jnp.allclose(loss, ref, rtol=1e-3, atol=1e-3), (m, float(loss), float(ref))

    # Default (auto) tile sizing -> single-tile fast path.
    for m in ['JSD', 'DV']:
        loss = local_global_loss(l_enc, g_enc, batch, measure=m)
        loss = jax.block_until_ready(loss)
        ref = _reference_loss(l_enc, g_enc, batch, m)
        assert jnp.allclose(loss, ref, rtol=1e-3, atol=1e-3), (m, float(loss), float(ref))

    print("KERNEL_OK")
</pallas_src>

<mosaic_0001>
module attributes {stable_mosaic.version = 11 : i64} {
  func.func @_local_global_loss_kernel(%arg0: i32, %arg1: i32, %arg2: memref<1x128xi32, #tpu.memory_space<vmem>>, %arg3: memref<6x64xf32, #tpu.memory_space<vmem>>, %arg4: memref<128x64xf32, #tpu.memory_space<vmem>>, %arg5: memref<1x1x1xf32, #tpu.memory_space<vmem>>, %arg6: memref<6x128xf32, #tpu.memory_space<vmem>>, %arg7: memref<6x1xf32, #tpu.memory_space<vmem>>, %arg8: memref<6x1xf32, #tpu.memory_space<vmem>>) attributes {dimension_semantics = [#tpu.dimension_semantics<parallel>, #tpu.dimension_semantics<arbitrary>], iteration_bounds = array<i64: 2, 2>, scalar_prefetch = 0 : i64, scratch_operands = 3 : i64, tpu.core_type = #tpu.core_type<tc>, window_params = [{transform_indices = @transform_0, window_bounds = array<i64: 1, 128>}, {pipeline_mode = #tpu.pipeline_mode<synchronous>, transform_indices = @transform_1, window_bounds = array<i64: 6, 64>}, {transform_indices = @transform_2, window_bounds = array<i64: 128, 64>}, {transform_indices = @transform_3, window_bounds = array<i64: 1, 1, 1>}]} {
    %c2_i32 = arith.constant 2 : i32
    %0 = arith.muli %arg0, %c2_i32 : i32
    %1 = arith.addi %0, %arg1 : i32
    %c128_i32 = arith.constant 128 : i32
    %2 = arith.muli %1, %c128_i32 : i32
    %c0_i32 = arith.constant 0 : i32
    %3 = arith.cmpi eq, %arg1, %c0_i32 : i32
    %4 = arith.extui %3 : i1 to i32
    %c0_i32_0 = arith.constant 0 : i32
    %5 = arith.cmpi ne, %4, %c0_i32_0 : i32
    scf.if %5 {
      %cst_18 = arith.constant 0.000000e+00 : f32
      %51 = vector.broadcast %cst_18 : f32 to vector<6x128xf32>
      %c0_19 = arith.constant 0 : index
      %c0_20 = arith.constant 0 : index
      %52 = vector.load %arg6[%c0_19, %c0_20] : memref<6x128xf32, #tpu.memory_space<vmem>>, vector<6x128xf32>
      tpu.vector_store %arg6[%c0_19, %c0_20], %51 {strides = array<i32>} : memref<6x128xf32, #tpu.memory_space<vmem>>, vector<6x128xf32>,
    } else {
    }
    %c0 = arith.constant 0 : index
    %c0_1 = arith.constant 0 : index
    %6 = vector.load %arg3[%c0, %c0_1] : memref<6x64xf32, #tpu.memory_space<vmem>>, vector<6x64xf32>
    %c0_2 = arith.constant 0 : index
    %c0_3 = arith.constant 0 : index
    %7 = vector.load %arg4[%c0_2, %c0_3] : memref<128x64xf32, #tpu.memory_space<vmem>>, vector<128x64xf32>
    %cst = arith.constant dense<0.000000e+00> : vector<6x128xf32>
    %8 = tpu.matmul %6, %7, %cst {dimension_numbers = #tpu.dot_dimension_numbers<[1], [1], [0], [0], [0, 0, 1, 0], [], []>, precision = #tpu.contract_precision<fp32>} : vector<6x64xf32>, vector<128x64xf32>, vector<6x128xf32> -> vector<6x128xf32>
    %9 = tpu.iota {dimensions = array<i32: 0>} : vector<6x128xi32>
    %c0_4 = arith.constant 0 : index
    %c0_5 = arith.constant 0 : index
    %10 = vector.load %arg2[%c0_4, %c0_5] : memref<1x128xi32, #tpu.memory_space<vmem>>, vector<1x128xi32>
    %11 = vector.broadcast %10 : vector<1x128xi32> to vector<6x128xi32>
    %12 = arith.cmpi eq, %11, %9 : vector<6x128xi32>
    %cst_6 = arith.constant 0.000000e+00 : f32
    %13 = vector.broadcast %cst_6 : f32 to vector<6x128xf32>
    %14 = arith.subf %13, %8 : vector<6x128xf32>
    %cst_7 = arith.constant 0.000000e+00 : f32
    %15 = vector.broadcast %cst_7 : f32 to vector<6x128xf32>
    %16 = arith.maximumf %14, %15 : vector<6x128xf32>
    %17 = vector.broadcast %cst_7 : f32 to vector<6x128xf32>
    %18 = arith.subf %14, %17 : vector<6x128xf32>
    %19 = arith.cmpf one, %18, %18 : vector<6x128xf32>
    %20 = vector.broadcast %cst_7 : f32 to vector<6x128xf32>
    %21 = arith.addf %14, %20 : vector<6x128xf32>
    %22 = math.absf %18 : vector<6x128xf32>
    %cst_8 = arith.constant 0.000000e+00 : f32
    %23 = vector.broadcast %cst_8 : f32 to vector<6x128xf32>
    %24 = arith.subf %23, %22 : vector<6x128xf32>
    %25 = math.exp %24 : vector<6x128xf32>
    %26 = math.log1p %25 : vector<6x128xf32>
    %27 = arith.addf %16, %26 : vector<6x128xf32>
    %28 = arith.select %19, %21, %27 : vector<6x128xi1>, vector<6x128xf32>
    %cst_9 = arith.constant 0.000000e+00 : f32
    %29 = vector.broadcast %cst_9 : f32 to vector<6x128xf32>
    %30 = arith.subf %29, %28 : vector<6x128xf32>
    %31 = arith.addf %28, %8 : vector<6x128xf32>
    %cst_10 = arith.constant 0.00333333341 : f32
    %32 = vector.broadcast %cst_10 : f32 to vector<6x128xf32>
    %33 = arith.mulf %30, %32 : vector<6x128xf32>
    %cst_11 = arith.constant 4.62098134E-4 : f32
    %34 = vector.broadcast %cst_11 : f32 to vector<6x128xf32>
    %35 = arith.subf %34, %33 : vector<6x128xf32>
    %cst_12 = arith.constant 6.66666659E-4 : f32
    %36 = vector.broadcast %cst_12 : f32 to vector<6x128xf32>
    %37 = arith.mulf %31, %36 : vector<6x128xf32>
    %cst_13 = arith.constant -0.0023104907 : f32
    %38 = vector.broadcast %cst_13 : f32 to vector<6x128xf32>
    %39 = arith.subf %37, %38 : vector<6x128xf32>
    %40 = arith.select %12, %35, %39 : vector<6x128xi1>, vector<6x128xf32>
    %c128_i32_14 = arith.constant 128 : i32
    %41 = arith.addi %2, %c128_i32_14 : i32
    %c300_i32 = arith.constant 300 : i32
    %42 = arith.cmpi sle, %41, %c300_i32 : i32
    %43 = arith.extui %42 : i1 to i32
    %c0_i32_15 = arith.constant 0 : i32
    %44 = arith.cmpi ne, %43, %c0_i32_15 : i32
    scf.if %44 {
      %c0_18 = arith.constant 0 : index
      %c0_19 = arith.constant 0 : index
      %51 = vector.load %arg6[%c0_18, %c0_19] : memref<6x128xf32, #tpu.memory_space<vmem>>, vector<6x128xf32>
      %52 = arith.addf %51, %40 : vector<6x128xf32>
      %c0_20 = arith.constant 0 : index
      %c0_21 = arith.constant 0 : index
      %53 = vector.load %arg6[%c0_20, %c0_21] : memref<6x128xf32, #tpu.memory_space<vmem>>, vector<6x128xf32>
      tpu.vector_store %arg6[%c0_20, %c0_21], %52 {strides = array<i32>} : memref<6x128xf32, #tpu.memory_space<vmem>>, vector<6x128xf32>,
    } else {
    }
    %true = arith.constant true
    %45 = arith.xori %42, %true : i1
    %46 = arith.extui %45 : i1 to i32
    %c0_i32_16 = arith.constant 0 : i32
    %47 = arith.cmpi ne, %46, %c0_i32_16 : i32
    scf.if %47 {
      %51 = tpu.iota {dimensions = array<i32: 1>} : vector<6x128xi32>
      %52 = vector.broadcast %2 : i32 to vector<6x128xi32>
      %53 = arith.addi %51, %52 : vector<6x128xi32>
      %c0_18 = arith.constant 0 : index
      %c0_19 = arith.constant 0 : index
      %54 = vector.load %arg6[%c0_18, %c0_19] : memref<6x128xf32, #tpu.memory_space<vmem>>, vector<6x128xf32>
      %c300_i32_20 = arith.constant 300 : i32
      %55 = vector.broadcast %c300_i32_20 : i32 to vector<6x128xi32>
      %56 = arith.cmpi slt, %53, %55 : vector<6x128xi32>
      %cst_21 = arith.constant 0.000000e+00 : f32
      %57 = vector.broadcast %cst_21 : f32 to vector<6x128xf32>
      %58 = arith.select %56, %40, %57 : vector<6x128xi1>, vector<6x128xf32>
      %59 = arith.addf %54, %58 : vector<6x128xf32>
      %c0_22 = arith.constant 0 : index
      %c0_23 = arith.constant 0 : index
      %60 = vector.load %arg6[%c0_22, %c0_23] : memref<6x128xf32, #tpu.memory_space<vmem>>, vector<6x128xf32>
      tpu.vector_store %arg6[%c0_22, %c0_23], %59 {strides = array<i32>} : memref<6x128xf32, #tpu.memory_space<vmem>>, vector<6x128xf32>,
    } else {
    }
    %c1_i32 = arith.constant 1 : i32
    %48 = arith.cmpi eq, %arg1, %c1_i32 : i32
    %49 = arith.extui %48 : i1 to i32
    %c0_i32_17 = arith.constant 0 : i32
    %50 = arith.cmpi ne, %49, %c0_i32_17 : i32
    scf.if %50 {
      %c0_18 = arith.constant 0 : index
      %c0_19 = arith.constant 0 : index
      %51 = vector.load %arg6[%c0_18, %c0_19] : memref<6x128xf32, #tpu.memory_space<vmem>>, vector<6x128xf32>
      %52 = vector.shape_cast %51 : vector<6x128xf32> to vector<1x6x128xf32>
      %cst_20 = arith.constant dense<0.000000e+00> : vector<1xf32>
      %53 = vector.multi_reduction <add>, %52, %cst_20 [1, 2] : vector<1x6x128xf32> to vector<1xf32>
      %54 = vector.shape_cast %53 : vector<1xf32> to vector<1x1x1xf32>
      %55 = vector.extract %54[0, 0, 0] : f32 from vector<1x1x1xf32>
      %56 = vector.broadcast %55 : f32 to vector<1x1x1xf32>
      %c0_21 = arith.constant 0 : index
      %c0_22 = arith.constant 0 : index
      %c0_23 = arith.constant 0 : index
      %57 = vector.load %arg5[%c0_21, %c0_22, %c0_23] : memref<1x1x1xf32, #tpu.memory_space<vmem>>, vector<1x1x1xf32>
      tpu.vector_store %arg5[%c0_21, %c0_22, %c0_23], %56 {strides = array<i32>} : memref<1x1x1xf32, #tpu.memory_space<vmem>>, vector<1x1x1xf32>,
    } else {
    }
    return
  }
  func.func @transform_0(%arg0: i32, %arg1: i32) -> (i32, i32) {
    %c2_i32 = arith.constant 2 : i32
    %0 = arith.muli %arg0, %c2_i32 : i32
    %1 = arith.addi %0, %arg1 : i32
    %c2_i32_0 = arith.constant 2 : i32
    %2 = arith.minsi %1, %c2_i32_0 : i32
    %c0_i32 = arith.constant 0 : i32
    %c0_i32_1 = arith.constant 0 : i32
    return %c0_i32, %2 : i32, i32
  }
  func.func @transform_1(%arg0: i32, %arg1: i32) -> (i32, i32) {
    %c0_i32 = arith.constant 0 : i32
    %c0_i32_0 = arith.constant 0 : i32
    %c0_i32_1 = arith.constant 0 : i32
    return %c0_i32, %c0_i32_0 : i32, i32
  }
  func.func @transform_2(%arg0: i32, %arg1: i32) -> (i32, i32) {
    %c2_i32 = arith.constant 2 : i32
    %0 = arith.muli %arg0, %c2_i32 : i32
    %1 = arith.addi %0, %arg1 : i32
    %c2_i32_0 = arith.constant 2 : i32
    %2 = arith.minsi %1, %c2_i32_0 : i32
    %c0_i32 = arith.constant 0 : i32
    %c0_i32_1 = arith.constant 0 : i32
    return %2, %c0_i32 : i32, i32
  }
  func.func @transform_3(%arg0: i32, %arg1: i32) -> (i32, i32, i32) {
    %c0_i32 = arith.constant 0 : i32
    %c0_i32_0 = arith.constant 0 : i32
    %c0_i32_1 = arith.constant 0 : i32
    return %arg0, %c0_i32, %c0_i32_0 : i32, i32, i32
  }
}

</mosaic_0001>

<bundles_post_ra>
// kernel: tpu_custom_call.1
= control target key start
LH: loop header
LB: loop body
LE: loop exit
PB: predicated region body
PF: predicated region fallthrough
CT: control target
= control target key end

     0   :  { %s1735_s12 = smov 0   ;;  %s1737_s13 = smov 0   ;;  %s2076_s0 = inlined_call_operand.vmem [shape: s32[1,300], index: 0, kind: input, shape index: {}]   ;;  %s2077_s1 = inlined_call_operand.vmem [shape: f32[6,64], index: 1, kind: input, shape index: {}]   ;;  %s2078_s2 = inlined_call_operand.vmem [shape: f32[300,64], index: 2, kind: input, shape index: {}]   ;;  %s2079_s3 = inlined_call_operand.vmem [shape: f32[2,1,1], index: 3, kind: output, shape index: {}]  }
   0x1   :  { %s1739_s14 = smov 0   ;;  %s1741_s15 = smov 0  }
   0x2   :  { %s1743_s16 = smov 0  }
   0x3 LB: > { %s22_s17 = sadd.s32 1, %s1701_s14  ;;  %s25_s18 = sadd.s32 1, %s1705_s15  ;;  %s1709_s16 = sphi %s1743_s16, %s13_s16   ;;  %s1705_s15 = sphi %s1741_s15, %s2083_s15   ;;  %s1701_s14 = sphi %s1739_s14, %s2082_s14   ;;  %s1697_s13 = sphi %s1737_s13, %s2081_s13   ;;  %s1693_s12 = sphi %s1735_s12, %s2080_s12  }
   0x4   : > { %p23_p0 = scmp.ge.s32.totalorder %s22_s17, 2  ;;  %p1138_p1 = scmp.ge.s32.totalorder %s1709_s16, 1 }
   0x5   : > { %p198_p2 = scmp.lt.s32.totalorder %s1709_s16, 5 }
   0x6   : > { %s2085_s17 = smov (%p23_p0, %s22_s17), 0  ;;  %s2087_s18 = smov (!%p23_p0, %s25_s18), %s1705_s15 }
   0x7   : > { %p199_p3 = pnand %p1138_p1, %p198_p2  ;;  %p27_p4 = scmp.ge.s32.totalorder %s2087_s18, 2 }
   0x8   : > { %s1139_s19 = sshll.u32 (!%p199_p3), %s1697_s13, 1  ;;  %p268_p5 = scmp.lt.s32.totalorder (!%p199_p3), %s1697_s13, 1 }
   0x9   : > { %s2089_s18 = smov (%p27_p4, %s2087_s18), 0  ;;  %202 = sbr.rel (%p199_p3) target bundleno = 710 (0x2c6), region = 32 }
   0xa   : > { %s1768_s20 = sadd.s32 (!%p199_p3), %s1693_s12, %s1139_s19  ;;  %p1148_p8 = scmp.ne.s32.totalorder (!%p199_p3), %s1693_s12, 0 }
   0xb   : > { %p237_p6 = scmp.lt.s32.totalorder (!%p199_p3), %s1768_s20, 2  ;;  %s1147_s21 = sshll.u32 (!%p199_p3), %s1768_s20, 7 }
  0x10   : > { %s2091_s13 = smov (!%p268_p5, %s1697_s13), 1  ;;  %v1711_v0 = vmov (!%p1148_p8), 0.0  }
  0x11   : > { %s238_s22 = scalar_select %p237_p6, %s1768_s20, 2 }
  0x12   : > { %s270_s25 = scalar_lea.vmem %s2079_s3, %s2091_s13  ;;  %278 = vst [vmem:[#allocation2] sm:$0x3f] (!%p1148_p8), %v1711_v0 }
  0x13   : > { %s1779_s26 = scalar_select %p237_p6, %s238_s22, 2 }
  0x14   : > { %s1144_s27 = sshll.u32 %s238_s22, 4  ;;  %277 = sbr.rel (%p1148_p8) target bundleno = 27 (0x1b), region = 36 }
  0x15   : > { %s241_s30 = scalar_lea.vmem %s2076_s0, %s1779_s26  ;;  %p255_p7 = scmp.lt.s32.totalorder %s1144_s27, 37 }
  0x17   : > { %s2093_s27 = smov (!%p255_p7, %s1144_s27), 37 }
  0x18   : > { %s1145_s4 = sshll.u32 %s2093_s27, 3 }
  0x19   : > { %s1788_s7 = scalar_lea.vmem %s2078_s2, %s1145_s4 }
  0x1b PF: > { %v280_v1 = vld [vmem:[%s1788_s7] sm:$0xff]  ;;  %v281_v2 = vld [vmem:[%s1788_s7 + $0x8] sm:$0xff]  ;;  %vm296_vm0 = vcmask 523264   ;;  %v282_v3 = vld [vmem:[%s1788_s7 + $0x10] sm:$0xff]  ;;  %v1712_v4 = vmov 0.0|0.0   ;;  %vm1713_vm1 = vmmov 0  }
  0x1c   : > { %1468 = vmatprep.subr.bf16.mxu1 %v1712_v4  ;;  %1540 = vmatprep.subr.bf16.mxu0 %v1712_v4  ;;  %v301_v5 = vsel %vm296_vm0, %v280_v1, 0  ;;  %v304_v6 = vsel %vm296_vm0, %v281_v2, 0  ;;  %v283_v7 = vld [vmem:[%s1788_s7 + $0x18] sm:$0xff]  ;;  %v307_v10 = vsel %vm296_vm0, %v282_v3, 0  ;;  %v284_v15 = vld [vmem:[%s1788_s7 + $0x20] sm:$0xff]  ;;  %v285_v16 = vld [vmem:[%s1788_s7 + $0x28] sm:$0xff] }
  0x1d   : > { %v349_v8 = vand.u32 4294901760, %v301_v5  ;;  %v352_v9 = vand.u32 4294901760, %v304_v6  ;;  %v310_v11 = vsel %vm296_vm0, %v283_v7, 0  ;;  %v355_v13 = vand.u32 4294901760, %v307_v10  ;;  %v286_v22 = vld [vmem:[%s1788_s7 + $0x30] sm:$0xff]  ;;  %v287_v23 = vld [vmem:[%s1788_s7 + $0x38] sm:$0xff] }
  0x1e   : > { %v358_v14 = vand.u32 4294901760, %v310_v11  ;;  %v313_v18 = vsel %vm296_vm0, %v284_v15, 0  ;;  %v316_v19 = vsel %vm296_vm0, %v285_v16, 0  ;;  %v1714_v24 = vmov 0.0   ;;  %v288_v30 = vld [vmem:[%s1788_s7 + $0x40] sm:$0xff]  ;;  %v289_v31 = vld [vmem:[%s1788_s7 + $0x48] sm:$0xff] }
  0x1f   : > { %v1801_v12 = vpack.c.bf16 %v352_v9, %v349_v8  ;;  %v361_v20 = vand.u32 4294901760, %v313_v18  ;;  %v364_v21 = vand.u32 4294901760, %v316_v19  ;;  %1290 = vmatprep.mubr.msk.f32.mxu1 %vm1713_vm1, %v1714_v24  ;;  %1395 = vmatprep.mubr.msk.f32.mxu0 %vm1713_vm1, %v1714_v24  ;;  %v319_v26 = vsel %vm296_vm0, %v286_v22, 0  ;;  %v290_v44 = vld [vmem:[%s1788_s7 + $0x50] sm:$0xff]  ;;  %v291_v45 = vld [vmem:[%s1788_s7 + $0x58] sm:$0xff]  ;;  %v292_v61 = vld [vmem:[%s1788_s7 + $0x60] sm:$0xff] }
  0x20   : > { %v1809_v17 = vpack.c.bf16 %v358_v14, %v355_v13  ;;  %v322_v27 = vsel %vm296_vm0, %v287_v23, 0  ;;  %v367_v28 = vand.u32 4294901760, %v319_v26  ;;  %v325_v32 = vsel %vm296_vm0, %v288_v30, 0  ;;  %v293_v62 = vld [vmem:[%s1788_s7 + $0x68] sm:$0xff]  ;;  %s2044_s10 = sadd.s32 128, %s1147_s21 }
  0x21   : > { %1470 = vmatpush3.bf16.xpose.msra.mxu1 %v1801_v12  ;;  %1542 = vmatpush3.bf16.xpose.msra.mxu0 %v1801_v12  ;;  %v1823_v25 = vpack.c.bf16 %v364_v21, %v361_v20  ;;  %v370_v29 = vand.u32 4294901760, %v322_v27  ;;  %v328_v34 = vsel %vm296_vm0, %v289_v31, 0  ;;  %v1837_v35 = vsub.f32 %v301_v5, %v349_v8  ;;  %p1151_p9 = scmp.gt.s32.totalorder %s2044_s10, 300 }
  0x22   : > { %1471 = vmatprep.subr.bf16.mxu1 %v1712_v4  ;;  %1543 = vmatprep.subr.bf16.mxu0 %v1712_v4  ;;  %v1839_v36 = vsub.f32 %v304_v6, %v352_v9  ;;  %v1841_v37 = vsub.f32 %v307_v10, %v355_v13  ;;  %v1843_v38 = vsub.f32 %v310_v11, %v358_v14  ;;  %v373_v39 = vand.u32 4294901760, %v325_v32  ;;  %v279_v6 = vld [vmem:[%s2077_s1] sm:$0x3f]  ;;  %v294_v9 = vld [vmem:[%s1788_s7 + $0x70] sm:$0xff]  ;;  %v295_v10 = vld [vmem:[%s1788_s7 + $0x78] sm:$0xff] }
  0x23   : > { %v1834_v33 = vpack.c.bf16 %v370_v29, %v367_v28  ;;  %v1845_v40 = vsub.f32 %v313_v18, %v361_v20  ;;  %v1847_v41 = vsub.f32 %v316_v19, %v364_v21  ;;  %v1849_v42 = vsub.f32 %v319_v26, %v367_v28 }
  0x24   : > { %v376_v43 = vand.u32 4294901760, %v328_v34  ;;  %v1854_v46 = vsub.f32 %v322_v27, %v370_v29  ;;  %v1857_v47 = vsub.f32 %v325_v32, %v373_v39  ;;  %v1517_v48 = vpack.c.bf16 %v1839_v36, %v1837_v35 }
  0x25   : > { %v1520_v50 = vpack.c.bf16 %v1843_v38, %v1841_v37  ;;  %v1523_v51 = vpack.c.bf16 %v1847_v41, %v1845_v40  ;;  %v331_v52 = vsel %vm296_vm0, %v290_v44, 0  ;;  %v334_v53 = vsel %vm296_vm0, %v291_v45, 0 }
  0x26   : > { %v1863_v49 = vsub.f32 %v328_v34, %v376_v43  ;;  %v1526_v54 = vpack.c.bf16 %v1854_v46, %v1849_v42  ;;  %v1875_v56 = vpack.c.bf16 %v376_v43, %v373_v39  ;;  %v379_v57 = vand.u32 4294901760, %v331_v52 }
  0x27   : > { %v382_v58 = vand.u32 4294901760, %v334_v53  ;;  %v337_v0 = vsel %vm296_vm0, %v292_v61, 0  ;;  %v340_v1 = vsel %vm296_vm0, %v293_v62, 0  ;;  %v298_v11 = vsel %vm296_vm0, %v279_v6, 0 }
  0x28   : > { %v1529_v55 = vpack.c.bf16 %v1863_v49, %v1857_v47  ;;  %v1877_v59 = vsub.f32 %v331_v52, %v379_v57  ;;  %v385_v3 = vand.u32 4294901760, %v337_v0  ;;  %v388_v5 = vand.u32 4294901760, %v340_v1 }
  0x29   : > { %1473 = vmatpush3.bf16.xpose.msra.mxu1 %v1809_v17  ;;  %1545 = vmatpush3.bf16.xpose.msra.mxu0 %v1809_v17  ;;  %v1879_v60 = vsub.f32 %v334_v53, %v382_v58  ;;  %v1891_v2 = vpack.c.bf16 %v382_v58, %v379_v57  ;;  %v343_v14 = vsel %vm296_vm0, %v294_v9, 0  ;;  %v346_v15 = vsel %vm296_vm0, %v295_v10, 0 }
  0x2a   : > { %1474 = vmatprep.subr.bf16.mxu1 %v1712_v4  ;;  %1546 = vmatprep.subr.bf16.mxu0 %v1712_v4  ;;  %v1896_v7 = vsub.f32 %v337_v0, %v385_v3  ;;  %v1898_v8 = vsub.f32 %v340_v1, %v388_v5  ;;  %v1911_v16 = vand.u32 4294901760, %v298_v11  ;;  %v1913_v18 = vpack.c.bf16 %v388_v5, %v385_v3 }
  0x2b   : > { %v1532_v63 = vpack.c.bf16 %v1879_v60, %v1877_v59  ;;  %v391_v19 = vand.u32 4294901760, %v343_v14  ;;  %v394_v20 = vand.u32 4294901760, %v346_v15  ;;  %v442_v26 = vand.u32 4294901760, %v1837_v35 }
  0x2c   : > { %v1535_v13 = vpack.c.bf16 %v1898_v8, %v1896_v7  ;;  %v1920_v23 = vsub.f32 %v298_v11, %v1911_v16  ;;  %v449_v27 = vand.u32 4294901760, %v1839_v36  ;;  %v456_v44 = vand.u32 4294901760, %v1841_v37 }
  0x2d   : > { %v1915_v21 = vsub.f32 %v343_v14, %v391_v19  ;;  %v1917_v22 = vsub.f32 %v346_v15, %v394_v20  ;;  %v1931_v30 = vpack.c.bf16 %v394_v20, %v391_v19  ;;  %v443_v31 = vsub.f32 %v1837_v35, %v442_v26 }
  0x2e   : > { %v431_v29 = vand.u32 4294901760, %v1920_v23  ;;  %v450_v32 = vsub.f32 %v1839_v36, %v449_v27  ;;  %v463_v45 = vand.u32 4294901760, %v1843_v38  ;;  %v1565_v57 = vpack.c.bf16 %v449_v27, %v442_v26 }
  0x2f   : > { %v1538_v28 = vpack.c.bf16 %v1917_v22, %v1915_v21  ;;  %v444_v39 = vand.u32 4294901760, %v443_v31  ;;  %v457_v58 = vsub.f32 %v1841_v37, %v456_v44  ;;  %v470_v1 = vand.u32 4294901760, %v1845_v40 }
  0x30   : > { %v432_v34 = vsub.f32 %v1920_v23, %v431_v29  ;;  %v451_v43 = vand.u32 4294901760, %v450_v32  ;;  %v464_v61 = vsub.f32 %v1843_v38, %v463_v45  ;;  %v477_v3 = vand.u32 4294901760, %v1847_v41 }
  0x31   : > { %1476 = vmatpush3.bf16.xpose.msra.mxu1 %v1823_v25  ;;  %1548 = vmatpush3.bf16.xpose.msra.mxu0 %v1823_v25  ;;  %v458_v62 = vand.u32 4294901760, %v457_v58  ;;  %v1568_v6 = vpack.c.bf16 %v463_v45, %v456_v44  ;;  %v471_v9 = vsub.f32 %v1845_v40, %v470_v1  ;;  %v484_v15 = vand.u32 4294901760, %v1849_v42 }
  0x32   : > { %1477 = vmatprep.subr.bf16.mxu1 %v1712_v4  ;;  %1549 = vmatprep.subr.bf16.mxu0 %v1712_v4  ;;  %v433_v52 = vand.u32 4294901760, %v432_v34  ;;  %v1493_v53 = vpack.c.bf16 %v451_v43, %v444_v39  ;;  %v465_v0 = vand.u32 4294901760, %v464_v61  ;;  %v478_v10 = vsub.f32 %v1847_v41, %v477_v3 }
  0x33   : > { %v472_v11 = vand.u32 4294901760, %v471_v9  ;;  %v491_v19 = vand.u32 4294901760, %v1854_v46  ;;  %v1571_v26 = vpack.c.bf16 %v477_v3, %v470_v1  ;;  %v485_v27 = vsub.f32 %v1849_v42, %v484_v15 }
  0x34   : > { %v1496_v5 = vpack.c.bf16 %v465_v0, %v458_v62  ;;  %v479_v14 = vand.u32 4294901760, %v478_v10  ;;  %v498_v34 = vand.u32 4294901760, %v1857_v47  ;;  %v505_v39 = vand.u32 4294901760, %v1863_v49 }
  0x35   : > { %v486_v31 = vand.u32 4294901760, %v485_v27  ;;  %v1574_v44 = vpack.c.bf16 %v491_v19, %v484_v15  ;;  %v512_v58 = vand.u32 4294901760, %v1877_v59  ;;  %v519_v61 = vand.u32 4294901760, %v1879_v60 }
  0x36   : > { %v1499_v20 = vpack.c.bf16 %v479_v14, %v472_v11  ;;  %v499_v45 = vsub.f32 %v1857_v47, %v498_v34  ;;  %v1577_v0 = vpack.c.bf16 %v505_v39, %v498_v34  ;;  %v526_v9 = vand.u32 4294901760, %v1896_v7 }
  0x37   : > { %v513_v1 = vsub.f32 %v1877_v59, %v512_v58  ;;  %v520_v3 = vsub.f32 %v1879_v60, %v519_v61  ;;  %v533_v10 = vand.u32 4294901760, %v1898_v8  ;;  %v1580_v14 = vpack.c.bf16 %v519_v61, %v512_v58  ;;  %v1149_v60 = vld [vmem:[%s241_s30] ss:$0 sm:$0xff] }
  0x38   : > { %v527_v15 = vsub.f32 %v1896_v7, %v526_v9  ;;  %v540_v27 = vand.u32 4294901760, %v1915_v21 }
  0x39   : > { %1479 = vmatpush3.bf16.xpose.msra.mxu1 %v1834_v33  ;;  %1551 = vmatpush3.bf16.xpose.msra.mxu0 %v1834_v33 }
  0x3a   : > { %1480 = vmatprep.subr.bf16.mxu1 %v1712_v4  ;;  %1552 = vmatprep.subr.bf16.mxu0 %v1712_v4  ;;  %v541_v34 = vsub.f32 %v1915_v21, %v540_v27  ;;  %v1028_v21 = vld [vmem:[#allocation2] sm:$0x3f] (!%p1151_p9) }
  0x41   : > { %1482 = vmatpush3.bf16.xpose.msra.mxu1 %v1875_v56  ;;  %1554 = vmatpush3.bf16.xpose.msra.mxu0 %v1875_v56 }
  0x42   : > { %1483 = vmatprep.subr.bf16.mxu1 %v1712_v4  ;;  %1555 = vmatprep.subr.bf16.mxu0 %v1712_v4 }
  0x49   : > { %1485 = vmatpush3.bf16.xpose.msra.mxu1 %v1891_v2  ;;  %1557 = vmatpush3.bf16.xpose.msra.mxu0 %v1891_v2 }
  0x4a   : > { %1486 = vmatprep.subr.bf16.mxu1 %v1712_v4  ;;  %1558 = vmatprep.subr.bf16.mxu0 %v1712_v4 }
  0x51   : > { %1488 = vmatpush3.bf16.xpose.msra.mxu1 %v1913_v18  ;;  %1560 = vmatpush3.bf16.xpose.msra.mxu0 %v1913_v18 }
  0x52   : > { %1489 = vmatprep.subr.bf16.mxu1 %v1712_v4  ;;  %1561 = vmatprep.subr.bf16.mxu0 %v1712_v4 }
  0x59   : > { %1491 = vmatpush3.bf16.xpose.msra.mxu1 %v1931_v30  ;;  %1563 = vmatpush3.bf16.xpose.msra.mxu0 %v1931_v30 }
  0x5a   : > { %1492 = vmatprep.subr.bf16.mxu1 %v1712_v4  ;;  %1564 = vmatprep.subr.bf16.mxu0 %v1712_v4 }
  0x60   : > { %1291 = vmatmul.mubr.f32.vlgmr.msra.gmra.mrb[0].mxu1 %v433_v52  ;;  %1396 = vmatmul.mubr.f32.vlgmr.msra.gmra.mrb[0].mxu0 %v431_v29  ;;  %v492_v29 = vsub.f32 %v1854_v46, %v491_v19  ;;  %v506_v52 = vsub.f32 %v1863_v49, %v505_v39  ;;  %v534_v19 = vsub.f32 %v1898_v8, %v533_v10 }
  0x61   : > { %1494 = vmatpush3.bf16.xpose.msra.mxu1 %v1493_v53  ;;  %1566 = vmatpush3.bf16.xpose.msra.mxu0 %v1565_v57  ;;  %v500_v53 = vand.u32 4294901760, %v499_v45 }
  0x62   : > { %1495 = vmatprep.subr.bf16.mxu1 %v1712_v4  ;;  %1567 = vmatprep.subr.bf16.mxu0 %v1712_v4  ;;  %v493_v32 = vand.u32 4294901760, %v492_v29  ;;  %v507_v57 = vand.u32 4294901760, %v506_v52  ;;  %v547_v29 = vand.u32 4294901760, %v1917_v22 }
  0x63   : > { %1325 = vmatprep.mubr.msk.f32.mxu1 %vm1713_vm1, %v1714_v24  ;;  %1430 = vmatprep.mubr.msk.f32.mxu0 %vm1713_vm1, %v1714_v24 }
  0x64   : > { %v1502_v43 = vpack.c.bf16 %v493_v32, %v486_v31  ;;  %v1505_v62 = vpack.c.bf16 %v507_v57, %v500_v53  ;;  %v1583_v32 = vpack.c.bf16 %v533_v10, %v526_v9  ;;  %v548_v39 = vsub.f32 %v1917_v22, %v547_v29 }
  0x65   : > { %v1586_v52 = vpack.c.bf16 %v547_v29, %v540_v27 }
  0x69   : > { %1497 = vmatpush3.bf16.xpose.msra.mxu1 %v1496_v5  ;;  %1569 = vmatpush3.bf16.xpose.msra.mxu0 %v1568_v6  ;;  %v514_v5 = vand.u32 4294901760, %v513_v1  ;;  %v521_v6 = vand.u32 4294901760, %v520_v3 }
  0x6a   : > { %1498 = vmatprep.subr.bf16.mxu1 %v1712_v4  ;;  %1570 = vmatprep.subr.bf16.mxu0 %v1712_v4 }
  0x6b   : > { %v1508_v11 = vpack.c.bf16 %v521_v6, %v514_v5 }
  0x71   : > { %1500 = vmatpush3.bf16.xpose.msra.mxu1 %v1499_v20  ;;  %1572 = vmatpush3.bf16.xpose.msra.mxu0 %v1571_v26  ;;  %v528_v20 = vand.u32 4294901760, %v527_v15  ;;  %v535_v26 = vand.u32 4294901760, %v534_v19 }
  0x72   : > { %1501 = vmatprep.subr.bf16.mxu1 %v1712_v4  ;;  %1573 = vmatprep.subr.bf16.mxu0 %v1712_v4 }
  0x73   : > { %v1511_v31 = vpack.c.bf16 %v535_v26, %v528_v20 }
  0x79   : > { %1503 = vmatpush3.bf16.xpose.msra.mxu1 %v1502_v43  ;;  %1575 = vmatpush3.bf16.xpose.msra.mxu0 %v1574_v44  ;;  %v542_v43 = vand.u32 4294901760, %v541_v34  ;;  %v549_v44 = vand.u32 4294901760, %v548_v39 }
  0x7a   : > { %1504 = vmatprep.subr.bf16.mxu1 %v1712_v4  ;;  %1576 = vmatprep.subr.bf16.mxu0 %v1712_v4 }
  0x7b   : > { %v1514_v45 = vpack.c.bf16 %v549_v44, %v542_v43 }
  0x81   : > { %1506 = vmatpush3.bf16.xpose.msra.mxu1 %v1505_v62  ;;  %1578 = vmatpush3.bf16.xpose.msra.mxu0 %v1577_v0 }
  0x82   : > { %1507 = vmatprep.subr.bf16.mxu1 %v1712_v4  ;;  %1579 = vmatprep.subr.bf16.mxu0 %v1712_v4 }
  0x89   : > { %1509 = vmatpush3.bf16.xpose.msra.mxu1 %v1508_v11  ;;  %1581 = vmatpush3.bf16.xpose.msra.mxu0 %v1580_v14 }
  0x8a   : > { %1510 = vmatprep.subr.bf16.mxu1 %v1712_v4  ;;  %1582 = vmatprep.subr.bf16.mxu0 %v1712_v4 }
  0x91   : > { %1512 = vmatpush3.bf16.xpose.msra.mxu1 %v1511_v31  ;;  %1584 = vmatpush3.bf16.xpose.msra.mxu0 %v1583_v32 }
  0x92   : > { %1513 = vmatprep.subr.bf16.mxu1 %v1712_v4  ;;  %1585 = vmatprep.subr.bf16.mxu0 %v1712_v4 }
  0x99   : > { %1515 = vmatpush3.bf16.xpose.msra.mxu1 %v1514_v45  ;;  %1587 = vmatpush3.bf16.xpose.msra.mxu0 %v1586_v52 }
  0x9a   : > { %1516 = vmatprep.subr.bf16.mxu1 %v1712_v4  ;;  %1588 = vmatprep.subr.bf16.mxu0 %v1712_v4 }
  0xa0   : > { %1326 = vmatmul.mubr.f32.vlgmr.msra.gmra.mrb[0].mxu1 %v1911_v16  ;;  %1431 = vmatmul.mubr.f32.vlgmr.msra.gmra.mrb[0].mxu0 %v1911_v16 }
  0xa1   : > { %1518 = vmatpush3.bf16.xpose.msra.mxu1 %v1517_v48  ;;  %1590 = vmatpush3.bf16.xpose.msra.mxu0 %v1801_v12 }
  0xa2   : > { %1519 = vmatprep.subr.bf16.mxu1 %v1712_v4  ;;  %1591 = vmatprep.subr.bf16.mxu0 %v1712_v4 }
  0xa3   : > { %1360 = vmatprep.mubr.msk.f32.mxu1 %vm1713_vm1, %v1714_v24  ;;  %1465 = vmatprep.mubr.msk.f32.mxu0 %vm1713_vm1, %v1714_v24 }
  0xa9   : > { %1521 = vmatpush3.bf16.xpose.msra.mxu1 %v1520_v50  ;;  %1593 = vmatpush3.bf16.xpose.msra.mxu0 %v1809_v17  ;;  %v989_v50 = vlaneseq }
  0xaa   : > { %1522 = vmatprep.subr.bf16.mxu1 %v1712_v4  ;;  %1594 = vmatprep.subr.bf16.mxu0 %v1712_v4 }
  0xb1   : > { %1524 = vmatpush3.bf16.xpose.msra.mxu1 %v1523_v51  ;;  %1596 = vmatpush3.bf16.xpose.msra.mxu0 %v1823_v25 }
  0xb2   : > { %1525 = vmatprep.subr.bf16.mxu1 %v1712_v4  ;;  %1597 = vmatprep.subr.bf16.mxu0 %v1712_v4 }
  0xb9   : > { %1527 = vmatpush3.bf16.xpose.msra.mxu1 %v1526_v54  ;;  %1599 = vmatpush3.bf16.xpose.msra.mxu0 %v1834_v33 }
  0xba   : > { %1528 = vmatprep.subr.bf16.mxu1 %v1712_v4  ;;  %1600 = vmatprep.subr.bf16.mxu0 %v1712_v4 }
  0xc1   : > { %1530 = vmatpush3.bf16.xpose.msra.mxu1 %v1529_v55  ;;  %1602 = vmatpush3.bf16.xpose.msra.mxu0 %v1875_v56  ;;  %v990_v56 = vshrl.u32 %v989_v50, 7 }
  0xc2   : > { %1531 = vmatprep.subr.bf16.mxu1 %v1712_v4  ;;  %1603 = vmatprep.subr.bf16.mxu0 %v1712_v4 }
  0xc3   : > { %vm996_vm4 = vcmp.eq.s32.totalorder %v1149_v60, %v990_v56 }
  0xc9   : > { %1533 = vmatpush3.bf16.xpose.msra.mxu1 %v1532_v63  ;;  %1605 = vmatpush3.bf16.xpose.msra.mxu0 %v1891_v2 }
  0xca   : > { %1534 = vmatprep.subr.bf16.mxu1 %v1712_v4  ;;  %1606 = vmatprep.subr.bf16.mxu0 %v1712_v4 }
  0xd1   : > { %1536 = vmatpush3.bf16.xpose.msra.mxu1 %v1535_v13  ;;  %1608 = vmatpush3.bf16.xpose.msra.mxu0 %v1913_v18 }
  0xd2   : > { %1537 = vmatprep.subr.bf16.mxu1 %v1712_v4  ;;  %1609 = vmatprep.subr.bf16.mxu0 %v1712_v4 }
  0xd9   : > { %1539 = vmatpush3.bf16.xpose.msra.mxu1 %v1538_v28  ;;  %1611 = vmatpush3.bf16.xpose.msra.mxu0 %v1931_v30 }
  0xe0   : > { %1361 = vmatmul.mubr.f32.vlgmr.msra.gmra.mrb[0].mxu1 %v1920_v23  ;;  %1466 = vmatmul.mubr.f32.vlgmr.msra.gmra.mrb[0].mxu0 %v1911_v16 }
 0x1b3   : > { %v690_v12 = vpop.f32.mrb[0].mxu1  ;;  %v985_v17 = vpop.f32.mrb[0].mxu0 }
 0x1b4   : > { %v1612_v24 = vadd.f32 %v985_v17, %v690_v12  ;;  %v1362_v25 = vpop.f32.mrb[1].mxu1  ;;  %v1467_v33 = vpop.f32.mrb[1].mxu0 }
 0x1b6   : > { %v997_v35 = vsub.f32 0.0, %v1612_v24 }
 0x1b8   : > { %v1001_v4 = vand.u32 2147483647, %v997_v35  ;;  %v998_v51 = vmax.f32 %v997_v35, 0.0  ;;  %vm999_vm3 = vcmp.ne.f32.partialorder %v997_v35, %v997_v35 }
 0x1ba   : > { %v1002_v36 = vsub.f32 0.0, %v1001_v4 }
 0x1bc   : > { %v1003_v37 = vmul.f32 1.442695, %v1002_v36 }
 0x1be   : > { %1667 = vpow2.f32 %v1003_v37 }
 0x1c8   : > { %v1668_v38 = vpop.eup %1667 }
 0x1c9   : > { %v1005_v40 = vadd.f32 1.0, %v1668_v38  ;;  %v1008_v41 = vmul.f32 -0.5, %v1668_v38  ;;  %v1011_v46 = vand.u32 2147483647, %v1668_v38 }
 0x1cb   : > { %1669 = vlog2.f32 %v1005_v40  ;;  %v1009_v42 = vadd.f32 1.0, %v1008_v41  ;;  %vm1012_vm2 = vcmp.lt.f32.partialorder %v1011_v46, 0.0004427343 }
 0x1cd   : > { %v1010_v49 = vmul.f32 %v1668_v38, %v1009_v42 }
 0x1d5   : > { %v1670_v47 = vpop.eup %1669 }
 0x1d6   : > { %v1007_v48 = vmul.f32 0.6931472, %v1670_v47 }
 0x1d8   : > { %v1013_v54 = vsel %vm1012_vm2, %v1010_v49, %v1007_v48 }
 0x1d9   : > { %v1014_v55 = vadd.f32 %v1013_v54, %v998_v51 }
 0x1db   : > { %v1015_v59 = vsel %vm999_vm3, %v997_v35, %v1014_v55 }
 0x1dc   : > { %v1016_v63 = vsub.f32 0.0, %v1015_v59  ;;  %v1017_v2 = vadd.f32 %v1612_v24, %v1015_v59  ;;  %1027 = sbr.rel (%p1151_p9) target bundleno = 486 (0x1e6), region = 40 }
 0x1de   : > { %v1018_v7 = vmul.f32 0.0033333334, %v1016_v63  ;;  %v1020_v8 = vmul.f32 0.00066666666, %v1017_v2 }
 0x1e0   : > { %v1019_v13 = vsub.f32 0.00046209813, %v1018_v7  ;;  %v1150_v16 = vadd.f32 0.0023104907, %v1020_v8 }
 0x1e2   : > { %v1022_v18 = vsel %vm996_vm4, %v1019_v13, %v1150_v16 }
 0x1e3   : > { %v1029_v22 = vadd.f32 %v1028_v21, %v1022_v18 }
 0x1e5   : > { %1030 = vst [vmem:[#allocation2] sm:$0x3f] %v1029_v22 }
 0x1e6 PF: > { %p1152_p10 = scmp.le.s32.totalorder %s2044_s10, 300 }
 0x1e7   : > { %v1036_v23 = vand.u32 (!%p1152_p10), 127, %v989_v50  ;;  %v1037_v28 = vstv (!%p1152_p10), %s1147_s21 }
 0x1e8   : > { %1034 = sbr.rel (%p1152_p10) target bundleno = 496 (0x1f0), region = 44 }
 0x1e9   : > { %v1038_v30 = vadd.s32 (!%p1152_p10), %v1037_v28, %v1036_v23 }
 0x1eb   : > { %vm1040_vm5 = vcmp.lt.s32.totalorder (!%p1152_p10), %v1038_v30, 300 }
 0x1ec   : > { %v1039_v53 = vld [vmem:[#allocation2] sm:$0x3f] (!%p1152_p10)  ;;  %v1041_v57 = vsel (!%p1152_p10), %vm1040_vm5, %v1022_v18, 0.0 }
 0x1ed   : > { %v1042_v58 = vadd.f32 (!%p1152_p10), %v1041_v57, %v1039_v53 }
 0x1ef   : > { %1043 = vst [vmem:[#allocation2] sm:$0x3f] %v1042_v58 }
 0x1f0 PF: > { %p1153_p11 = scmp.ne.s32.totalorder %s1693_s12, 1 }
 0x1f1   : > { %vm1049_vm6 = vcmask (!%p1153_p11), 1045504   ;;  %vm1061_vm7 = vcmask (!%p1153_p11), 0  }
 0x1f2   : > { %1047 = sbr.rel (%p1153_p11) target bundleno = 710 (0x2c6), region = 48 }
 0x1f6   : > { %v1048_v61 = vld [vmem:[#allocation2] sm:$0x3f] (!%p1153_p11) }
 0x1f7   : > { %v1050_v62 = vsel (!%p1153_p11), %vm1049_vm6, %v1048_v61, 0.0 }
 0x1f8   : > { %1051 = vadd.xlane.f32.xlu0 (!%p1153_p11), %v1050_v62 }
 0x285   : > { %v1052_v0 = vpop.xlane.xlu0 %1051 }
 0x286   : > { %v1053_v1 = vrot.slane %v1052_v0, 4 }
 0x288   : > { %v1054_v3 = vadd.f32 %v1053_v1, %v1052_v0 }
 0x28a   : > { %v1055_v5 = vrot.slane %v1054_v3, 2 }
 0x28c   : > { %v1056_v6 = vadd.f32 %v1055_v5, %v1054_v3 }
 0x28e   : > { %v1057_v9 = vrot.slane %v1056_v6, 1 }
 0x290   : > { %v1058_v10 = vadd.f32 %v1057_v9, %v1056_v6 }
 0x292   : > { %1621 = vpush %v1058_v10 }
 0x2c3   : > { %s1622_s20 = spop %1621 }
 0x2c4   : > { %v1060_v11 = vstv %s1622_s20 }
 0x2c5   : > { %1062 = vst.msk [vmem:[%s270_s25] sm:$0x1] %vm1061_vm7, %v1060_v11 }
 0x2c6 PF: > { %s13_s16 = sadd.s32 1, %s1709_s16   ;;  %s2080_s12 = smov %s1701_s14 }
 0x2c7   : > { %p10_p12 = scmp.ge.s32.totalorder %s13_s16, 6   ;;  %s2081_s13 = smov %s1705_s15 }
 0x2c8   : > { %s2082_s14 = smov %s2085_s17  ;;  %s2083_s15 = smov %s2089_s18 }
 0x2c9   :  { %12 = sbr.rel (!%p10_p12) target bundleno = 3 (0x3), region = 81 }

</bundles_post_ra>
